<compile_context>
chip_gen: v7x
topology: tpu7x:2x2x1
jax: 0.10.0
libtpu: 0.0.40
codegen_flags: <defaults>
</compile_context>

<pallas_src>
import math

import jax
import jax.numpy as jnp
from jax.experimental import pallas as pl
from jax.experimental.pallas import tpu as pltpu


def _round_up(x, m):
    return (x + m - 1) // m * m


def _vmem_capacity_bytes():
    try:
        return int(pltpu.get_tpu_info().vmem_capacity_bytes)
    except Exception:
        return 64 << 20  # conservative (v7x per-TensorCore)


def ff_kernel(x_ref, w1s_ref, b1s_ref, w2_ref, b2_ref, w3_ref, b3_ref, o_ref):
    Dp = w2_ref.shape[0]
    x = x_ref[...]                                    # (tile_m, Dp), matmul dtype

    # Layer 1 + shortcut fused: one MXU pass, (tile_m, Dp) @ (Dp, 2*Dp), f32 acc.
    hs = jnp.dot(x, w1s_ref[...], preferred_element_type=jnp.float32) + b1s_ref[...]
    h = jnp.maximum(hs[:, :Dp], 0.0)                  # layer-1 activation
    s = hs[:, Dp:]                                    # shortcut (no ReLU)

    h = jnp.dot(h.astype(w2_ref.dtype), w2_ref[...],
                preferred_element_type=jnp.float32) + b2_ref[...]
    h = jnp.maximum(h, 0.0)
    h = jnp.dot(h.astype(w3_ref.dtype), w3_ref[...],
                preferred_element_type=jnp.float32) + b3_ref[...]
    h = jnp.maximum(h, 0.0)

    o_ref[...] = (h + s).astype(o_ref.dtype)


def _pick_tile_m(N, Dp, x_item, out_item, w_item, vmem_cap):
    """Largest batch tile (preferring MXU-filling 256/512) whose working set fits VMEM."""
    resident = 4 * Dp * Dp * w_item + 4 * Dp * 4      # [W1|Ws] + W2 + W3 (single-buffered) + biases
    budget = int(0.8 * vmem_cap)
    candidates = [512, 256, 128, 64, 32, 16]
    fitting = []
    for c in candidates:
        per_tile = (2 * c * Dp * x_item               # double-buffered x tile
                    + 2 * c * Dp * out_item           # double-buffered out tile
                    + 6 * c * Dp * 4)                 # in-kernel f32 intermediates (hs, h, s)
        if resident + per_tile <= budget:
            fitting.append(c)
    if not fitting:
        fitting = [16]
    n_aligned = _round_up(max(N, 16), 16)
    tile_m = None
    for c in fitting:                                  # largest tile that doesn't grossly overshoot N
        if c <= n_aligned:
            tile_m = c
            break
    if tile_m is None:
        tile_m = fitting[-1]
    # Prefer >= 2 grid steps so a v7x megacore can shard the batch axis.
    if pl.cdiv(n_aligned, tile_m) < 2:
        for c in fitting:
            if c < tile_m and pl.cdiv(n_aligned, c) >= 2:
                tile_m = c
                break
    return tile_m


def ff_forward(x, params, *, use_bf16=True, tile_m=None):
    """x: (N, D). params: transposed weights 'w?_t' (D, D, in x out) and biases 'b?' (1, D)."""
    N, D = x.shape
    out_dtype = x.dtype
    wdt = jnp.bfloat16 if use_bf16 else jnp.float32

    # Lane-dense padding: last dim of every block must be a multiple of 128.
    Dp = _round_up(max(D, 128), 128)

    vmem_cap = _vmem_capacity_bytes()
    if tile_m is None:
        tile_m = _pick_tile_m(N, Dp,
                              jnp.dtype(wdt).itemsize,
                              jnp.dtype(out_dtype).itemsize,
                              jnp.dtype(wdt).itemsize,
                              vmem_cap)
    tile_m = max(16, _round_up(int(tile_m), 16))
    Np = _round_up(max(N, tile_m), tile_m)

    def pad_w(w):
        if Dp != D:
            w = jnp.pad(w, ((0, Dp - D), (0, Dp - D)))
        return w.astype(wdt)

    def pad_b(b):
        if Dp != D:
            b = jnp.pad(b, ((0, 0), (0, Dp - D)))
        return b.astype(jnp.float32)

    # Fuse the shortcut into layer 1: [W1 | Ws] -> (Dp, 2*Dp), [b1 | bs] -> (1, 2*Dp).
    w1s = jnp.concatenate([pad_w(params["w1_t"]), pad_w(params["ws_t"])], axis=1)
    b1s = jnp.concatenate([pad_b(params["b1"]), pad_b(params["bs"])], axis=1)
    w2, w3 = pad_w(params["w2_t"]), pad_w(params["w3_t"])
    b2, b3 = pad_b(params["b2"]), pad_b(params["b3"])

    # Stream x in the matmul dtype (bf16 halves input HBM traffic); skip pad if aligned.
    if Np != N or Dp != D:
        xp = jnp.pad(x, ((0, Np - N), (0, Dp - D))).astype(wdt)
    else:
        xp = x.astype(wdt)

    grid = (Np // tile_m,)

    x_spec = pl.BlockSpec((tile_m, Dp), lambda i: (i, 0))
    o_spec = pl.BlockSpec((tile_m, Dp), lambda i: (i, 0))
    # Weights / biases are grid-invariant -> resident, single-buffered.
    w1s_spec = pl.BlockSpec((Dp, 2 * Dp), lambda i: (0, 0), pipeline_mode=pl.Buffered(1))
    b1s_spec = pl.BlockSpec((1, 2 * Dp), lambda i: (0, 0), pipeline_mode=pl.Buffered(1))
    w_spec = pl.BlockSpec((Dp, Dp), lambda i: (0, 0), pipeline_mode=pl.Buffered(1))
    b_spec = pl.BlockSpec((1, Dp), lambda i: (0, 0), pipeline_mode=pl.Buffered(1))

    # VMEM budget: resident weights/biases + double-buffered x/out tiles +
    # in-kernel f32 intermediates, with headroom, capped at device capacity.
    resident = 4 * Dp * Dp * jnp.dtype(wdt).itemsize + 4 * Dp * 4
    per_tile = (2 * tile_m * Dp * jnp.dtype(wdt).itemsize
                + 2 * tile_m * Dp * jnp.dtype(out_dtype).itemsize
                + 6 * tile_m * Dp * 4)
    vmem_limit = int(1.2 * (resident + per_tile)) + (4 << 20)
    vmem_limit = min(max(vmem_limit, 32 << 20), vmem_cap)

    out = pl.pallas_call(
        ff_kernel,
        out_shape=jax.ShapeDtypeStruct((Np, Dp), out_dtype),
        grid_spec=pltpu.PrefetchScalarGridSpec(
            num_scalar_prefetch=0,
            grid=grid,
            in_specs=[x_spec, w1s_spec, b1s_spec, w_spec, b_spec, w_spec, b_spec],
            out_specs=o_spec,
        ),
        compiler_params=pltpu.CompilerParams(
            dimension_semantics=("parallel",),
            vmem_limit_bytes=vmem_limit,
        ),
    )(xp, w1s, b1s, w2, b2, w3, b3)

    if Np != N or Dp != D:
        out = out[:N, :D]
    return out


def init_ff_params(key, input_dim):
    """Deterministic init matching the shapes of FF(input_dim)."""
    D = input_dim
    keys = jax.random.split(key, 8)
    scale = 1.0 / math.sqrt(D)

    def lin(kw, kb):
        # PyTorch nn.Linear weight is (out, in); we store the transpose (in, out).
        w = jax.random.uniform(kw, (D, D), jnp.float32, -scale, scale)
        b = jax.random.uniform(kb, (1, D), jnp.float32, -scale, scale)
        return w.T, b

    w1_t, b1 = lin(keys[0], keys[1])
    w2_t, b2 = lin(keys[2], keys[3])
    w3_t, b3 = lin(keys[4], keys[5])
    ws_t, bs = lin(keys[6], keys[7])
    return dict(w1_t=w1_t, b1=b1, w2_t=w2_t, b2=b2,
                w3_t=w3_t, b3=b3, ws_t=ws_t, bs=bs)


def ff_reference(x, p, *, use_bf16=True):
    """Pure-JAX reference applying the same bf16-operand / f32-accumulate casts."""
    wdt = jnp.bfloat16 if use_bf16 else jnp.float32

    def dot(a, w):
        return jax.lax.dot(a.astype(wdt), w.astype(wdt),
                           preferred_element_type=jnp.float32)

    h = jax.nn.relu(dot(x, p["w1_t"]) + p["b1"])
    h = jax.nn.relu(dot(h, p["w2_t"]) + p["b2"])
    h = jax.nn.relu(dot(h, p["w3_t"]) + p["b3"])
    return (h + dot(x, p["ws_t"]) + p["bs"]).astype(x.dtype)


if __name__ == "__main__":
    key = jax.random.PRNGKey(0)
    k1, k2, k3, k4 = jax.random.split(key, 4)

    # Case 1: tiny shapes matching the InfoGraph module (batch 8, hidden 32).
    N1, D1 = 8, 32
    x1 = jax.random.normal(k1, (N1, D1), jnp.float32)
    p1 = init_ff_params(k2, D1)
    out1 = jax.block_until_ready(ff_forward(x1, p1))
    ref1 = ff_reference(x1, p1)
    assert out1.shape == (N1, D1)
    assert jnp.allclose(out1, ref1, atol=2e-2, rtol=2e-2), "case 1 mismatch vs reference"

    # Case 2: non-divisible batch + non-128 D; exercises padding and a multi-step grid.
    N2, D2 = 272, 96
    x2 = jax.random.normal(k3, (N2, D2), jnp.float32)
    p2 = init_ff_params(k4, D2)
    out2 = jax.block_until_ready(ff_forward(x2, p2))
    ref2 = ff_reference(x2, p2)
    assert out2.shape == (N2, D2)
    assert jnp.allclose(out2, ref2, atol=2e-2, rtol=2e-2), "case 2 mismatch vs reference"

    print("KERNEL_OK")
</pallas_src>

<mosaic_0001>
module attributes {stable_mosaic.version = 11 : i64} {
  func.func @ff_kernel(%arg0: i32, %arg1: memref<16x128xbf16, #tpu.memory_space<vmem>>, %arg2: memref<128x256xbf16, #tpu.memory_space<vmem>>, %arg3: memref<1x256xf32, #tpu.memory_space<vmem>>, %arg4: memref<128x128xbf16, #tpu.memory_space<vmem>>, %arg5: memref<1x128xf32, #tpu.memory_space<vmem>>, %arg6: memref<128x128xbf16, #tpu.memory_space<vmem>>, %arg7: memref<1x128xf32, #tpu.memory_space<vmem>>, %arg8: memref<16x128xf32, #tpu.memory_space<vmem>>) attributes {dimension_semantics = [#tpu.dimension_semantics<parallel>], iteration_bounds = array<i64: 1>, scalar_prefetch = 0 : i64, scratch_operands = 0 : i64, tpu.core_type = #tpu.core_type<tc>, window_params = [{transform_indices = @transform_0, window_bounds = array<i64: 16, 128>}, {pipeline_mode = #tpu.pipeline_mode<synchronous>, transform_indices = @transform_1, window_bounds = array<i64: 128, 256>}, {pipeline_mode = #tpu.pipeline_mode<synchronous>, transform_indices = @transform_2, window_bounds = array<i64: 1, 256>}, {pipeline_mode = #tpu.pipeline_mode<synchronous>, transform_indices = @transform_3, window_bounds = array<i64: 128, 128>}, {pipeline_mode = #tpu.pipeline_mode<synchronous>, transform_indices = @transform_4, window_bounds = array<i64: 1, 128>}, {pipeline_mode = #tpu.pipeline_mode<synchronous>, transform_indices = @transform_5, window_bounds = array<i64: 128, 128>}, {pipeline_mode = #tpu.pipeline_mode<synchronous>, transform_indices = @transform_6, window_bounds = array<i64: 1, 128>}, {transform_indices = @transform_7, window_bounds = array<i64: 16, 128>}]} {
    %c0 = arith.constant 0 : index
    %c0_0 = arith.constant 0 : index
    %0 = vector.load %arg1[%c0, %c0_0] : memref<16x128xbf16, #tpu.memory_space<vmem>>, vector<16x128xbf16>
    %c0_1 = arith.constant 0 : index
    %c0_2 = arith.constant 0 : index
    %1 = vector.load %arg2[%c0_1, %c0_2] : memref<128x256xbf16, #tpu.memory_space<vmem>>, vector<128x256xbf16>
    %cst = arith.constant dense<0.000000e+00> : vector<16x256xf32>
    %2 = tpu.matmul %0, %1, %cst {dimension_numbers = #tpu.dot_dimension_numbers<[1], [0], [0], [1], [0, 0, 1, 1], [], []>} : vector<16x128xbf16>, vector<128x256xbf16>, vector<16x256xf32> -> vector<16x256xf32>
    %c0_3 = arith.constant 0 : index
    %c0_4 = arith.constant 0 : index
    %3 = vector.load %arg3[%c0_3, %c0_4] : memref<1x256xf32, #tpu.memory_space<vmem>>, vector<1x256xf32>
    %4 = vector.broadcast %3 : vector<1x256xf32> to vector<16x256xf32>
    %5 = arith.addf %2, %4 : vector<16x256xf32>
    %6 = vector.extract_strided_slice %5 {offsets = [0, 0], sizes = [16, 128], strides = [1, 1]} : vector<16x256xf32> to vector<16x128xf32>
    %cst_5 = arith.constant 0.000000e+00 : f32
    %7 = vector.broadcast %cst_5 : f32 to vector<16x128xf32>
    %8 = arith.maximumf %6, %7 : vector<16x128xf32>
    %9 = vector.extract_strided_slice %5 {offsets = [0, 128], sizes = [16, 128], strides = [1, 1]} : vector<16x256xf32> to vector<16x128xf32>
    %10 = arith.truncf %8 : vector<16x128xf32> to vector<16x128xbf16>
    %c0_6 = arith.constant 0 : index
    %c0_7 = arith.constant 0 : index
    %11 = vector.load %arg4[%c0_6, %c0_7] : memref<128x128xbf16, #tpu.memory_space<vmem>>, vector<128x128xbf16>
    %cst_8 = arith.constant dense<0.000000e+00> : vector<16x128xf32>
    %12 = tpu.matmul %10, %11, %cst_8 {dimension_numbers = #tpu.dot_dimension_numbers<[1], [0], [0], [1], [0, 0, 1, 1], [], []>} : vector<16x128xbf16>, vector<128x128xbf16>, vector<16x128xf32> -> vector<16x128xf32>
    %c0_9 = arith.constant 0 : index
    %c0_10 = arith.constant 0 : index
    %13 = vector.load %arg5[%c0_9, %c0_10] : memref<1x128xf32, #tpu.memory_space<vmem>>, vector<1x128xf32>
    %14 = vector.broadcast %13 : vector<1x128xf32> to vector<16x128xf32>
    %15 = arith.addf %12, %14 : vector<16x128xf32>
    %cst_11 = arith.constant 0.000000e+00 : f32
    %16 = vector.broadcast %cst_11 : f32 to vector<16x128xf32>
    %17 = arith.maximumf %15, %16 : vector<16x128xf32>
    %18 = arith.truncf %17 : vector<16x128xf32> to vector<16x128xbf16>
    %c0_12 = arith.constant 0 : index
    %c0_13 = arith.constant 0 : index
    %19 = vector.load %arg6[%c0_12, %c0_13] : memref<128x128xbf16, #tpu.memory_space<vmem>>, vector<128x128xbf16>
    %cst_14 = arith.constant dense<0.000000e+00> : vector<16x128xf32>
    %20 = tpu.matmul %18, %19, %cst_14 {dimension_numbers = #tpu.dot_dimension_numbers<[1], [0], [0], [1], [0, 0, 1, 1], [], []>} : vector<16x128xbf16>, vector<128x128xbf16>, vector<16x128xf32> -> vector<16x128xf32>
    %c0_15 = arith.constant 0 : index
    %c0_16 = arith.constant 0 : index
    %21 = vector.load %arg7[%c0_15, %c0_16] : memref<1x128xf32, #tpu.memory_space<vmem>>, vector<1x128xf32>
    %22 = vector.broadcast %21 : vector<1x128xf32> to vector<16x128xf32>
    %23 = arith.addf %20, %22 : vector<16x128xf32>
    %cst_17 = arith.constant 0.000000e+00 : f32
    %24 = vector.broadcast %cst_17 : f32 to vector<16x128xf32>
    %25 = arith.maximumf %23, %24 : vector<16x128xf32>
    %26 = arith.addf %25, %9 : vector<16x128xf32>
    %c0_18 = arith.constant 0 : index
    %c0_19 = arith.constant 0 : index
    %27 = vector.load %arg8[%c0_18, %c0_19] : memref<16x128xf32, #tpu.memory_space<vmem>>, vector<16x128xf32>
    tpu.vector_store %arg8[%c0_18, %c0_19], %26 {strides = array<i32>} : memref<16x128xf32, #tpu.memory_space<vmem>>, vector<16x128xf32>,
    return
  }
  func.func @transform_0(%arg0: i32) -> (i32, i32) {
    %c0_i32 = arith.constant 0 : i32
    %c0_i32_0 = arith.constant 0 : i32
    return %arg0, %c0_i32 : i32, i32
  }
  func.func @transform_1(%arg0: i32) -> (i32, i32) {
    %c0_i32 = arith.constant 0 : i32
    %c0_i32_0 = arith.constant 0 : i32
    %c0_i32_1 = arith.constant 0 : i32
    return %c0_i32, %c0_i32_0 : i32, i32
  }
  func.func @transform_2(%arg0: i32) -> (i32, i32) {
    %c0_i32 = arith.constant 0 : i32
    %c0_i32_0 = arith.constant 0 : i32
    %c0_i32_1 = arith.constant 0 : i32
    return %c0_i32, %c0_i32_0 : i32, i32
  }
  func.func @transform_3(%arg0: i32) -> (i32, i32) {
    %c0_i32 = arith.constant 0 : i32
    %c0_i32_0 = arith.constant 0 : i32
    %c0_i32_1 = arith.constant 0 : i32
    return %c0_i32, %c0_i32_0 : i32, i32
  }
  func.func @transform_4(%arg0: i32) -> (i32, i32) {
    %c0_i32 = arith.constant 0 : i32
    %c0_i32_0 = arith.constant 0 : i32
    %c0_i32_1 = arith.constant 0 : i32
    return %c0_i32, %c0_i32_0 : i32, i32
  }
  func.func @transform_5(%arg0: i32) -> (i32, i32) {
    %c0_i32 = arith.constant 0 : i32
    %c0_i32_0 = arith.constant 0 : i32
    %c0_i32_1 = arith.constant 0 : i32
    return %c0_i32, %c0_i32_0 : i32, i32
  }
  func.func @transform_6(%arg0: i32) -> (i32, i32) {
    %c0_i32 = arith.constant 0 : i32
    %c0_i32_0 = arith.constant 0 : i32
    %c0_i32_1 = arith.constant 0 : i32
    return %c0_i32, %c0_i32_0 : i32, i32
  }
  func.func @transform_7(%arg0: i32) -> (i32, i32) {
    %c0_i32 = arith.constant 0 : i32
    %c0_i32_0 = arith.constant 0 : i32
    return %arg0, %c0_i32 : i32, i32
  }
}

</mosaic_0001>

<bundles_post_ra>
// kernel: tpu_custom_call.1
= control target key start
LH: loop header
LB: loop body
LE: loop exit
PB: predicated region body
PF: predicated region fallthrough
CT: control target
= control target key end

     0   :  { %12 = vsyncpa [#allocation3], 0  ;;  %s922_s0 = inlined_call_operand.hbm [shape: bf16[16,128], index: 0, kind: input, shape index: {}]   ;;  %s923_s1 = inlined_call_operand.hbm [shape: bf16[128,256], index: 1, kind: input, shape index: {}]   ;;  %s924_s2 = inlined_call_operand.vmem [shape: f32[1,256], index: 2, kind: input, shape index: {}]   ;;  %s925_s3 = inlined_call_operand.hbm [shape: bf16[128,128], index: 3, kind: input, shape index: {}]   ;;  %s926_s4 = inlined_call_operand.vmem [shape: f32[1,128], index: 4, kind: input, shape index: {}]   ;;  %s927_s5 = inlined_call_operand.hbm [shape: bf16[128,128], index: 5, kind: input, shape index: {}]   ;;  %s928_s6 = inlined_call_operand.vmem [shape: f32[1,128], index: 6, kind: input, shape index: {}]   ;;  %s929_s7 = inlined_call_operand.hbm [shape: f32[16,128], index: 7, kind: output, shape index: {}]  }
   0x1   :  { %13 = vsyncpa [#allocation6], 0 }
   0x2   :  { %14 = vsyncpa [#allocation9], 0 }
   0x3   :  { %15 = vsyncpa [#allocation4], 0  ;;  %s761_s24 = smov [#allocation5]   ;;  %s643_s28 = scalar_lea.hbm %s923_s1, 2048 }
   0x4   :  { %s33_s25 = sshll.u32 %s761_s24, 4  ;;  %p644_p0 = scmp.ne.s32.totalorder %s923_s1, %s643_s28  ;;  %s34_s25 = int_to_ptr.vmem [resolvable:$true] %s33_s25 }
   0x5   :  { %p647_p1 = scmp.lt.u32.totalorder %s643_s28, %s923_s1 }
   0x7   :  { %p649_p2 = pnand %p647_p1, %p644_p0 }
   0x9   :  { %652 = shalt.err (!%p649_p2)
}
   0xa   :  { %s653_s10 = scalar_lea.vmem %s34_s25, 2048  ;;  %p658_p4 = scmp.lt.s32.totalorder %s34_s25, %s34_s25 }
   0xb   :  { %p654_p3 = scmp.ne.s32.totalorder %s34_s25, %s653_s10  ;;  %p659_p5 = scmp.lt.s32.totalorder %s653_s10, %s653_s10 }
   0xd   :  { %p660_p6 = por %p659_p5, %p658_p4 }
   0xf   :  { %p661_p7 = pnand %p660_p6, %p654_p3 }
  0x11   :  { %664 = shalt.err (!%p661_p7)
}
  0x12   :  { %s762_s11 = smov 128   ;;  %s763_s12 = smov 8  }
  0x13   :  { %39 = dma.hbm_to_vmem [thread:$0]  %s923_s1, 2048, %s34_s25, [#allocation6], %s762_s11, %s762_s11, %s763_s12  }
  0x14   :  { %s764_s15 = smov [#allocation2]   ;;  %s665_s19 = scalar_lea.hbm %s922_s0, 128 }
  0x15   :  { %s21_s16 = sshll.u32 %s764_s15, 4  ;;  %p666_p8 = scmp.ne.s32.totalorder %s922_s0, %s665_s19  ;;  %s22_s16 = int_to_ptr.vmem [resolvable:$true] %s21_s16 }
  0x16   :  { %p669_p9 = scmp.lt.u32.totalorder %s665_s19, %s922_s0 }
  0x18   :  { %p671_p10 = pnand %p669_p9, %p666_p8 }
  0x1a   :  { %674 = shalt.err (!%p671_p10)
}
  0x1b   :  { %s675_s24 = scalar_lea.vmem %s22_s16, 128  ;;  %p680_p12 = scmp.lt.s32.totalorder %s22_s16, %s22_s16 }
  0x1c   :  { %p676_p11 = scmp.ne.s32.totalorder %s22_s16, %s675_s24  ;;  %p681_p13 = scmp.lt.s32.totalorder %s675_s24, %s675_s24 }
  0x1e   :  { %p682_p0 = por %p681_p13, %p680_p12 }
  0x20   :  { %p683_p1 = pnand %p682_p0, %p676_p11 }
  0x22   :  { %686 = shalt.err (!%p683_p1)
}
  0x23   :  { %s765_s1 = smov 64   ;;  %s766_s25 = smov 4  }
  0x24   :  { %27 = dma.hbm_to_vmem [thread:$0]  %s922_s0, 128, %s22_s16, [#allocation3], %s765_s1, %s765_s1, %s766_s25  }
  0x25   :  { %s767_s28 = smov [#allocation7]   ;;  %s768_s30 = smov [#allocation8]  }
  0x26   :  { %s47_s29 = sshll.u32 %s767_s28, 4  ;;  %s61_s8 = sshll.u32 %s768_s30, 4  ;;  %s48_s29 = int_to_ptr.vmem [resolvable:$true] %s47_s29  ;;  %s843_s8 = int_to_ptr.vmem [resolvable:$true] %s61_s8 }
  0x27   :  { %s687_s13 = scalar_lea.hbm %s925_s3, 1024 }
  0x28   :  { %p688_p2 = scmp.ne.s32.totalorder %s925_s3, %s687_s13  ;;  %p691_p3 = scmp.lt.u32.totalorder %s687_s13, %s925_s3 }
  0x2a   :  { %p693_p4 = pnand %p691_p3, %p688_p2 }
  0x2c   :  { %696 = shalt.err (!%p693_p4)
}
  0x2d   :  { %s697_s0 = scalar_lea.vmem %s48_s29, 1024  ;;  %p702_p6 = scmp.lt.s32.totalorder %s48_s29, %s48_s29 }
  0x2e   :  { %p698_p5 = scmp.ne.s32.totalorder %s48_s29, %s697_s0  ;;  %p703_p7 = scmp.lt.s32.totalorder %s697_s0, %s697_s0 }
  0x30   :  { %p704_p8 = por %p703_p7, %p702_p6 }
  0x32   :  { %p705_p9 = pnand %p704_p8, %p698_p5 }
  0x34   :  { %708 = shalt.err (!%p705_p9)
}
  0x35   :  { %53 = dma.hbm_to_vmem [thread:$0]  %s925_s3, 1024, %s48_s29, [#allocation6], %s765_s1, %s765_s1, %s766_s25  }
  0x36   :  { %s709_s22 = scalar_lea.hbm %s927_s5, 1024 }
  0x37   :  { %p710_p10 = scmp.ne.s32.totalorder %s927_s5, %s709_s22  ;;  %p713_p11 = scmp.lt.u32.totalorder %s709_s22, %s927_s5 }
  0x39   :  { %p715_p12 = pnand %p713_p11, %p710_p10 }
  0x3b   :  { %718 = shalt.err (!%p715_p12)
}
  0x3c   :  { %s719_s28 = scalar_lea.vmem %s843_s8, 1024  ;;  %p724_p0 = scmp.lt.s32.totalorder %s843_s8, %s843_s8 }
  0x3d   :  { %p720_p13 = scmp.ne.s32.totalorder %s843_s8, %s719_s28  ;;  %p725_p1 = scmp.lt.s32.totalorder %s719_s28, %s719_s28 }
  0x3f   :  { %p726_p2 = por %p725_p1, %p724_p0 }
  0x41   :  { %p727_p3 = pnand %p726_p2, %p720_p13 }
  0x43   :  { %730 = shalt.err (!%p727_p3)
}
  0x44   :  { %67 = dma.hbm_to_vmem [thread:$0]  %s927_s5, 1024, %s843_s8, [#allocation9], %s765_s1, %s765_s1, %s766_s25  }
  0x45   :  { %753 = dma.done.wait [#allocation3], 128  }
  0x46   :  { %754 = vsyncadd [#allocation3], 4294967168 }
  0x47   :  { %755 = dma.done.wait [#allocation6], 3072  }
  0x48   :  { %756 = vsyncadd [#allocation6], 4294964224 }
  0x49   :  { %757 = dma.done.wait [#allocation9], 1024  }
  0x4a   :  { %758 = vsyncadd [#allocation9], 4294966272  ;;  %v769_v0 = vmov 0   ;;  %v770_v1 = vmov 0.0   ;;  %v602_v2 = vld [vmem:[#allocation5 + $0x4] ss:$8 sps:$4 sm:$0xff]   ;;  %v103_v33 = vlaneseq }
  0x4b   :  { %231 = vmatprep.mubr.bf16.mxu0 %v769_v0  ;;  %550 = vmatprep.subr.bf16.mxu1 %v770_v1  ;;  %v604_v3 = vld [vmem:[#allocation5] ss:$8 sps:$4 sm:$0xff]   ;;  %v605_v4 = vld [vmem:[#allocation5 + $0x14] ss:$8 sps:$4 sm:$0xff]   ;;  %v607_v5 = vld [vmem:[#allocation5 + $0x10] ss:$8 sps:$4 sm:$0xff]  }
  0x4c   :  { %199 = vmatprep.subr.bf16.mxu0 %v602_v2  ;;  %v608_v6 = vld [vmem:[#allocation5 + $0x24] ss:$8 sps:$4 sm:$0xff]   ;;  %v610_v7 = vld [vmem:[#allocation5 + $0x20] ss:$8 sps:$4 sm:$0xff]   ;;  %v611_v8 = vld [vmem:[#allocation5 + $0x34] ss:$8 sps:$4 sm:$0xff]  }
  0x4d   :  { %200 = vmatpush1.bf16.msra.mxu0 %v604_v3  ;;  %v613_v9 = vld [vmem:[#allocation5 + $0x30] ss:$8 sps:$4 sm:$0xff]   ;;  %v614_v10 = vld [vmem:[#allocation5 + $0x44] ss:$8 sps:$4 sm:$0xff]   ;;  %v616_v13 = vld [vmem:[#allocation5 + $0x40] ss:$8 sps:$4 sm:$0xff]  }
  0x4e   :  { %201 = vmatprep.subr.bf16.mxu0 %v605_v4  ;;  %v627_v11 = vld [vmem:[#allocation7] sm:$0xff]   ;;  %v628_v12 = vld [vmem:[#allocation7 + $0x8] sm:$0xff]   ;;  %v617_v14 = vld [vmem:[#allocation5 + $0x54] ss:$8 sps:$4 sm:$0xff]   ;;  %vm771_vm0 = vmmov 0   ;;  %v104_v34 = vshrl.u32 %v103_v33, 7 }
  0x4f   :  { %551 = vmatpush3.bf16.msra.mxu1 %v627_v11  ;;  %v619_v15 = vld [vmem:[#allocation5 + $0x50] ss:$8 sps:$4 sm:$0xff]   ;;  %v620_v17 = vld [vmem:[#allocation5 + $0x64] ss:$8 sps:$4 sm:$0xff]   ;;  %v622_v19 = vld [vmem:[#allocation5 + $0x60] ss:$8 sps:$4 sm:$0xff]   ;;  %566 = vmatprep.mubr.msk.bf16.mxu1 %vm771_vm0, %v770_v1 }
  0x50   :  { %552 = vmatprep.subr.bf16.mxu1 %v770_v1  ;;  %v629_v16 = vld [vmem:[#allocation7 + $0x10] sm:$0xff]   ;;  %v630_v18 = vld [vmem:[#allocation7 + $0x18] sm:$0xff]   ;;  %v631_v21 = vld [vmem:[#allocation7 + $0x20] sm:$0xff]   ;;  %v105_v35 = vsub.s32 0, %v104_v34  ;;  %v109_v59 = vsub.s32 1, %v104_v34 }
  0x51   :  { %202 = vmatpush1.bf16.msra.mxu0 %v607_v5  ;;  %v623_v20 = vld [vmem:[#allocation5 + $0x74] ss:$8 sps:$4 sm:$0xff]   ;;  %v625_v22 = vld [vmem:[#allocation5 + $0x70] ss:$8 sps:$4 sm:$0xff]   ;;  %v632_v24 = vld [vmem:[#allocation7 + $0x28] sm:$0xff]  }
  0x52   :  { %203 = vmatprep.subr.bf16.mxu0 %v608_v6  ;;  %v626_v23 = vld [vmem:[#allocation2] sm:$0xff]   ;;  %v633_v25 = vld [vmem:[#allocation7 + $0x30] sm:$0xff]   ;;  %v635_v27 = vld [vmem:[#allocation8] sm:$0xff]  }
  0x53   :  { %553 = vmatpush3.bf16.msra.mxu1 %v628_v12  ;;  %v634_v26 = vld [vmem:[#allocation7 + $0x38] sm:$0xff]   ;;  %v636_v28 = vld [vmem:[#allocation8 + $0x8] sm:$0xff]   ;;  %v637_v29 = vld [vmem:[#allocation8 + $0x10] sm:$0xff]  }
  0x54   :  { %554 = vmatprep.subr.bf16.mxu1 %v770_v1  ;;  %v638_v30 = vld [vmem:[#allocation8 + $0x18] sm:$0xff]   ;;  %v639_v31 = vld [vmem:[#allocation8 + $0x20] sm:$0xff]   ;;  %v640_v32 = vld [vmem:[#allocation8 + $0x28] sm:$0xff]  }
  0x55   :  { %204 = vmatpush1.bf16.msra.mxu0 %v610_v7  ;;  %v101_v36 = vld [vmem:[%s924_s2] sm:$0x3]  ;;  %v641_v47 = vld [vmem:[#allocation8 + $0x30] sm:$0xff]  }
  0x56   :  { %205 = vmatprep.subr.bf16.mxu0 %v611_v8  ;;  %v106_v37 = vrot.slane %v101_v36, %v105_v35  ;;  %v642_v48 = vld [vmem:[#allocation8 + $0x38] sm:$0xff]   ;;  %v110_v61 = vrot.slane %v101_v36, %v109_v59 }
  0x57   :  { %555 = vmatpush3.bf16.msra.mxu1 %v629_v16  ;;  %v514_v49 = vld [vmem:[%s926_s4] ss:$0 sm:$0xff]  ;;  %s772_s4 = smov [#allocation10]  }
  0x58   :  { %556 = vmatprep.subr.bf16.mxu1 %v770_v1  ;;  %v523_v60 = vld [vmem:[%s928_s6] ss:$0 sm:$0xff]  ;;  %s483_s9 = sshll.u32 %s772_s4, 4  ;;  %s484_s9 = int_to_ptr.vmem [resolvable:$true] %s483_s9 }
  0x59   :  { %206 = vmatpush1.bf16.msra.mxu0 %v613_v9  ;;  %s731_s10 = scalar_lea.vmem %s484_s9, 256  ;;  %p736_p5 = scmp.lt.s32.totalorder %s484_s9, %s484_s9 }
  0x5a   :  { %207 = vmatprep.subr.bf16.mxu0 %v614_v10  ;;  %p732_p4 = scmp.ne.s32.totalorder %s484_s9, %s731_s10  ;;  %p737_p6 = scmp.lt.s32.totalorder %s731_s10, %s731_s10 }
  0x5b   :  { %557 = vmatpush3.bf16.msra.mxu1 %v630_v18 }
  0x5c   :  { %558 = vmatprep.subr.bf16.mxu1 %v770_v1  ;;  %p738_p7 = por %p737_p6, %p736_p5 }
  0x5d   :  { %208 = vmatpush1.bf16.msra.mxu0 %v616_v13 }
  0x5e   :  { %209 = vmatprep.subr.bf16.mxu0 %v617_v14  ;;  %p739_p8 = pnand %p738_p7, %p732_p4 }
  0x5f   :  { %559 = vmatpush3.bf16.msra.mxu1 %v631_v21 }
  0x60   :  { %560 = vmatprep.subr.bf16.mxu1 %v770_v1 }
  0x61   :  { %210 = vmatpush1.bf16.msra.mxu0 %v619_v15 }
  0x62   :  { %211 = vmatprep.subr.bf16.mxu0 %v620_v17 }
  0x63   :  { %561 = vmatpush3.bf16.msra.mxu1 %v632_v24 }
  0x64   :  { %562 = vmatprep.subr.bf16.mxu1 %v770_v1 }
  0x65   :  { %212 = vmatpush1.bf16.msra.mxu0 %v622_v19 }
  0x66   :  { %213 = vmatprep.subr.bf16.mxu0 %v623_v20 }
  0x67   :  { %563 = vmatpush3.bf16.msra.mxu1 %v633_v25 }
  0x68   :  { %564 = vmatprep.subr.bf16.mxu1 %v770_v1 }
  0x69   :  { %214 = vmatpush1.bf16.msra.mxu0 %v625_v22 }
  0x6a   :  { %570 = vmatprep.subr.bf16.mxu0 %v770_v1 }
  0x6b   :  { %565 = vmatpush3.bf16.msra.mxu1 %v634_v26 }
  0x6c   :  { %232 = vmatmul.mubr.bf16.vlgmr.msra.gmra.mrb[0].mxu0 %v626_v23 }
  0x6d   :  { %586 = vmatprep.mubr.msk.bf16.mxu0 %vm771_vm0, %v770_v1  ;;  %571 = vmatpush3.bf16.msra.mxu0 %v635_v27 }
  0x6e   :  { %572 = vmatprep.subr.bf16.mxu0 %v770_v1 }
  0x71   :  { %573 = vmatpush3.bf16.msra.mxu0 %v636_v28 }
  0x72   :  { %574 = vmatprep.subr.bf16.mxu0 %v770_v1 }
  0x75   :  { %575 = vmatpush3.bf16.msra.mxu0 %v637_v29 }
  0x76   :  { %576 = vmatprep.subr.bf16.mxu0 %v770_v1 }
  0x79   :  { %577 = vmatpush3.bf16.msra.mxu0 %v638_v30 }
  0x7a   :  { %578 = vmatprep.subr.bf16.mxu0 %v770_v1 }
  0x7d   :  { %579 = vmatpush3.bf16.msra.mxu0 %v639_v31 }
  0x7e   :  { %580 = vmatprep.subr.bf16.mxu0 %v770_v1 }
  0x81   :  { %581 = vmatpush3.bf16.msra.mxu0 %v640_v32 }
  0x82   :  { %582 = vmatprep.subr.bf16.mxu0 %v770_v1 }
  0x85   :  { %583 = vmatpush3.bf16.msra.mxu0 %v641_v47 }
  0x86   :  { %584 = vmatprep.subr.bf16.mxu0 %v770_v1 }
  0x89   :  { %585 = vmatpush3.bf16.msra.mxu0 %v642_v48 }
 0x13f   :  { %v233_v38 = vpop.f32.mrb[0].mxu0 }
 0x140   :  { %v234_v39 = vadd.f32 %v233_v38, %v106_v37  ;;  %v235_v40 = vpop.f32.mrb[1].mxu0 }
 0x141   :  { %v237_v41 = vpop.f32.mrb[2].mxu0  ;;  %v236_v2 = vadd.f32 %v235_v40, %v110_v61 }
 0x142   :  { %v238_v42 = vadd.f32 %v237_v41, %v106_v37  ;;  %v239_v43 = vpop.f32.mrb[3].mxu0  ;;  %v242_v44 = vmax.f32 %v234_v39, 0.0 }
 0x143   :  { %v240_v6 = vadd.f32 %v239_v43, %v110_v61 }
 0x144   :  { %v243_v45 = vmax.f32 %v238_v42, 0.0 }
 0x146   :  { %v244_v46 = vpack.c.bf16 %v243_v45, %v242_v44 }
 0x148   :  { %567 = vmatmul.mubr.bf16.vlgmr.msra.gmra.mrb[0].mxu1 %v244_v46 }
 0x21b   :  { %v350_v50 = vpop.f32.mrb[0].mxu1 }
 0x21c   :  { %v351_v51 = vadd.f32 %v514_v49, %v350_v50  ;;  %v568_v52 = vpop.f32.mrb[1].mxu1 }
 0x21d   :  { %v353_v53 = vpop.f32.mrb[2].mxu1 }
 0x21e   :  { %v354_v54 = vadd.f32 %v514_v49, %v353_v53  ;;  %v569_v55 = vpop.f32.mrb[3].mxu1  ;;  %v357_v56 = vmax.f32 %v351_v51, 0.0 }
 0x220   :  { %v358_v57 = vmax.f32 %v354_v54, 0.0 }
 0x222   :  { %v359_v58 = vpack.c.bf16 %v358_v57, %v357_v56 }
 0x224   :  { %587 = vmatmul.mubr.bf16.vlgmr.msra.gmra.mrb[4].mxu0 %v359_v58 }
 0x2f7   :  { %v465_v62 = vpop.f32.mrb[4].mxu0 }
 0x2f8   :  { %v466_v63 = vadd.f32 %v523_v60, %v465_v62  ;;  %v588_v0 = vpop.f32.mrb[5].mxu0 }
 0x2f9   :  { %v468_v1 = vpop.f32.mrb[6].mxu0 }
 0x2fa   :  { %v472_v3 = vmax.f32 %v466_v63, 0.0  ;;  %v469_v4 = vadd.f32 %v523_v60, %v468_v1  ;;  %v589_v5 = vpop.f32.mrb[7].mxu0 }
 0x2fc   :  { %v474_v7 = vadd.f32 %v472_v3, %v236_v2  ;;  %v473_v8 = vmax.f32 %v469_v4, 0.0 }
 0x2fe   :  { %476 = vst [vmem:[#allocation10] sm:$0xff] %v474_v7  ;;  %v475_v9 = vadd.f32 %v473_v8, %v240_v6 }
 0x300   :  { %477 = vst [vmem:[#allocation10 + $0x8] sm:$0xff] %v475_v9 }
 0x301   :  { %742 = shalt.err (!%p739_p8)
}
 0x302   :  { %s743_s14 = scalar_lea.hbm %s929_s7, 256 }
 0x303   :  { %p744_p9 = scmp.ne.s32.totalorder %s929_s7, %s743_s14  ;;  %p747_p10 = scmp.lt.u32.totalorder %s743_s14, %s929_s7 }
 0x305   :  { %p749_p11 = pnand %p747_p10, %p744_p9 }
 0x307   :  { %752 = shalt.err (!%p749_p11)
}
 0x308   :  { %489 = dma.vmem_to_hbm [thread:$0]  %s484_s9, 256, %s929_s7, [#allocation4], %s762_s11, %s762_s11, %s763_s12  }
 0x309   :  { %759 = dma.done.wait [#allocation4], 256  }
 0x30a   :  { %760 = vsyncadd [#allocation4], 4294967040 }
 0x30b   :  { %493 = vsyncpa [#allocation3], 1 }
 0x30c   :  { %494 = vsyncpa [#allocation6], 1 }
 0x30d   :  { %495 = vsyncpa [#allocation9], 1 }
 0x30e   :  { %496 = vsyncpa [#allocation4], 1 }

</bundles_post_ra>
